<compile_context>
chip_gen: v7x
topology: tpu7x:2x2x1
jax: 0.10.0
libtpu: 0.0.40
codegen_flags: <defaults>
</compile_context>

<pallas_src>
import jax
import jax.numpy as jnp
from jax.experimental import pallas as pl
from jax.experimental.pallas import tpu as pltpu


def _mlp_softmax_kernel(x_ref, w1_ref, b1_ref, w2_ref, b2_ref, o_ref):
    # Layer 1: (Bt, F) @ (F, H) on the MXU with f32 accumulation, + bias, ReLU.
    h = jnp.dot(x_ref[...], w1_ref[...], preferred_element_type=jnp.float32)
    h = jnp.maximum(h + b1_ref[...], 0.0)          # (Bt, H) + (1, H) broadcast

    # Layer 2: (Bt, H) @ (H, O)
    logits = jnp.dot(h, w2_ref[...], preferred_element_type=jnp.float32)
    logits = logits + b2_ref[...]                  # (Bt, O) + (1, O) broadcast

    out_classes = o_ref.shape[-1]
    if out_classes == 2:
        # 2-class softmax == sigmoid of the logit difference; avoids the
        # cross-lane max/sum reductions and one of the two exp evaluations.
        d = logits[:, 1:2] - logits[:, 0:1]                      # (Bt, 1)
        p1 = pl.reciprocal(1.0 + jnp.exp(-d), approx=False)       # (Bt, 1)
        probs = jnp.concatenate([1.0 - p1, p1], axis=-1)          # (Bt, 2)
    else:
        # Numerically stable softmax along dim=1 for the general case.
        m = jnp.max(logits, axis=-1, keepdims=True)
        e = jnp.exp(logits - m)
        probs = e * pl.reciprocal(jnp.sum(e, axis=-1, keepdims=True), approx=False)

    o_ref[...] = probs.astype(o_ref.dtype)


def heart_disease_forward(x, w1, b1, w2, b2, *, batch_tile=2048):
    """softmax(relu(x @ w1 + b1) @ w2 + b2, axis=1) as a Pallas TPU kernel."""
    B, F = x.shape
    H = w1.shape[1]
    O = w2.shape[1]

    if B <= batch_tile:
        # Small batch: single invocation, no grid -> no pipelining machinery.
        # Entire working set (<~100 KiB here) lives in VMEM for the kernel.
        vmem_spec = pl.BlockSpec(memory_space=pltpu.MemorySpace.VMEM)
        return pl.pallas_call(
            _mlp_softmax_kernel,
            out_shape=jax.ShapeDtypeStruct((B, O), jnp.float32),
            in_specs=[vmem_spec] * 5,
            out_specs=vmem_spec,
        )(x, w1, b1, w2, b2)

    # Large batch: tile only the batch dim. Weights/biases use index_map (0, 0)
    # so they stay resident; last-dim blocks equal the full feature dims, so the
    # (8, 128) rule is satisfied via the full-extent exception.
    bt = batch_tile
    n_tiles = pl.cdiv(B, bt)
    pad = n_tiles * bt - B
    if pad:
        x = jnp.pad(x, ((0, pad), (0, 0)))

    out = pl.pallas_call(
        _mlp_softmax_kernel,
        out_shape=jax.ShapeDtypeStruct((n_tiles * bt, O), jnp.float32),
        grid=(n_tiles,),
        in_specs=[
            pl.BlockSpec((bt, F), lambda i: (i, 0)),   # x: batch-tiled
            pl.BlockSpec((F, H), lambda i: (0, 0)),    # w1: pinned
            pl.BlockSpec((1, H), lambda i: (0, 0)),    # b1: pinned
            pl.BlockSpec((H, O), lambda i: (0, 0)),    # w2: pinned
            pl.BlockSpec((1, O), lambda i: (0, 0)),    # b2: pinned
        ],
        out_specs=pl.BlockSpec((bt, O), lambda i: (i, 0)),
        compiler_params=pltpu.CompilerParams(
            # Batch tiles are independent -> shard across v7x's 2 TensorCores.
            dimension_semantics=("parallel",),
        ),
    )(x, w1, b1, w2, b2)
    return out[:B] if pad else out


def init_params(key, input_size, hidden_size, output_size):
    # Deterministic init mimicking torch.nn.Linear's U(-1/sqrt(fan_in), 1/sqrt(fan_in)).
    k1, k2, k3, k4 = jax.random.split(key, 4)
    bound1 = 1.0 / jnp.sqrt(input_size)
    bound2 = 1.0 / jnp.sqrt(hidden_size)
    w1 = jax.random.uniform(k1, (input_size, hidden_size), jnp.float32, -bound1, bound1)
    b1 = jax.random.uniform(k2, (1, hidden_size), jnp.float32, -bound1, bound1)
    w2 = jax.random.uniform(k3, (hidden_size, output_size), jnp.float32, -bound2, bound2)
    b2 = jax.random.uniform(k4, (1, output_size), jnp.float32, -bound2, bound2)
    return w1, b1, w2, b2


if __name__ == "__main__":
    # Heart-disease-like shapes: 13 features, 32 hidden, 2 classes.
    input_size, hidden_size, output_size = 13, 32, 2

    key = jax.random.PRNGKey(0)
    kx, kp, kb = jax.random.split(key, 3)
    w1, b1, w2, b2 = init_params(kp, input_size, hidden_size, output_size)

    def reference(x):
        h = jnp.maximum(x @ w1 + b1, 0.0)
        return jax.nn.softmax(h @ w2 + b2, axis=1)

    # 1) Small batch -> single-invocation (no-grid) path.
    x_small = jax.random.normal(kx, (8, input_size), dtype=jnp.float32)
    out_small = jax.block_until_ready(heart_disease_forward(x_small, w1, b1, w2, b2))
    assert out_small.shape == (8, output_size)
    assert jnp.allclose(out_small, reference(x_small), atol=1e-5, rtol=1e-5)

    # 2) Larger batch -> batch-tiled path (weights pinned, "parallel" batch axis).
    x_big = jax.random.normal(kb, (512, input_size), dtype=jnp.float32)
    out_big = jax.block_until_ready(
        heart_disease_forward(x_big, w1, b1, w2, b2, batch_tile=128)
    )
    assert out_big.shape == (512, output_size)
    assert jnp.allclose(out_big, reference(x_big), atol=1e-5, rtol=1e-5)

    print("KERNEL_OK")
</pallas_src>

<mosaic_0001>
module attributes {stable_mosaic.version = 11 : i64} {
  func.func @_mlp_softmax_kernel(%arg0: memref<8x13xf32, #tpu.memory_space<vmem>>, %arg1: memref<13x32xf32, #tpu.memory_space<vmem>>, %arg2: memref<1x32xf32, #tpu.memory_space<vmem>>, %arg3: memref<32x2xf32, #tpu.memory_space<vmem>>, %arg4: memref<1x2xf32, #tpu.memory_space<vmem>>, %arg5: memref<8x2xf32, #tpu.memory_space<vmem>>) attributes {dimension_semantics = [], scalar_prefetch = 0 : i64, scratch_operands = 0 : i64, tpu.core_type = #tpu.core_type<tc>} {
    %c0 = arith.constant 0 : index
    %c0_0 = arith.constant 0 : index
    %0 = vector.load %arg0[%c0, %c0_0] : memref<8x13xf32, #tpu.memory_space<vmem>>, vector<8x13xf32>
    %c0_1 = arith.constant 0 : index
    %c0_2 = arith.constant 0 : index
    %1 = vector.load %arg1[%c0_1, %c0_2] : memref<13x32xf32, #tpu.memory_space<vmem>>, vector<13x32xf32>
    %cst = arith.constant dense<0.000000e+00> : vector<8x32xf32>
    %2 = tpu.matmul %0, %1, %cst {dimension_numbers = #tpu.dot_dimension_numbers<[1], [0], [0], [1], [0, 0, 1, 1], [], []>} : vector<8x13xf32>, vector<13x32xf32>, vector<8x32xf32> -> vector<8x32xf32>
    %c0_3 = arith.constant 0 : index
    %c0_4 = arith.constant 0 : index
    %3 = vector.load %arg2[%c0_3, %c0_4] : memref<1x32xf32, #tpu.memory_space<vmem>>, vector<1x32xf32>
    %4 = vector.broadcast %3 : vector<1x32xf32> to vector<8x32xf32>
    %5 = arith.addf %2, %4 : vector<8x32xf32>
    %cst_5 = arith.constant 0.000000e+00 : f32
    %6 = vector.broadcast %cst_5 : f32 to vector<8x32xf32>
    %7 = arith.maximumf %5, %6 : vector<8x32xf32>
    %c0_6 = arith.constant 0 : index
    %c0_7 = arith.constant 0 : index
    %8 = vector.load %arg3[%c0_6, %c0_7] : memref<32x2xf32, #tpu.memory_space<vmem>>, vector<32x2xf32>
    %cst_8 = arith.constant dense<0.000000e+00> : vector<8x2xf32>
    %9 = tpu.matmul %7, %8, %cst_8 {dimension_numbers = #tpu.dot_dimension_numbers<[1], [0], [0], [1], [0, 0, 1, 1], [], []>} : vector<8x32xf32>, vector<32x2xf32>, vector<8x2xf32> -> vector<8x2xf32>
    %c0_9 = arith.constant 0 : index
    %c0_10 = arith.constant 0 : index
    %10 = vector.load %arg4[%c0_9, %c0_10] : memref<1x2xf32, #tpu.memory_space<vmem>>, vector<1x2xf32>
    %11 = vector.broadcast %10 : vector<1x2xf32> to vector<8x2xf32>
    %12 = arith.addf %9, %11 : vector<8x2xf32>
    %13 = vector.extract_strided_slice %12 {offsets = [0, 1], sizes = [8, 1], strides = [1, 1]} : vector<8x2xf32> to vector<8x1xf32>
    %14 = vector.extract_strided_slice %12 {offsets = [0, 0], sizes = [8, 1], strides = [1, 1]} : vector<8x2xf32> to vector<8x1xf32>
    %15 = arith.subf %13, %14 : vector<8x1xf32>
    %cst_11 = arith.constant 0.000000e+00 : f32
    %16 = vector.broadcast %cst_11 : f32 to vector<8x1xf32>
    %17 = arith.subf %16, %15 : vector<8x1xf32>
    %18 = math.exp %17 : vector<8x1xf32>
    %cst_12 = arith.constant 1.000000e+00 : f32
    %19 = vector.broadcast %cst_12 : f32 to vector<8x1xf32>
    %20 = arith.addf %19, %18 : vector<8x1xf32>
    %21 = tpu.reciprocal %20 : vector<8x1xf32> -> vector<8x1xf32>
    %cst_13 = arith.constant 1.000000e+00 : f32
    %22 = vector.broadcast %cst_13 : f32 to vector<8x1xf32>
    %23 = arith.subf %22, %21 : vector<8x1xf32>
    %24 = tpu.concatenate %23, %21 in 1 : vector<8x1xf32>, vector<8x1xf32> -> vector<8x2xf32>
    %c0_14 = arith.constant 0 : index
    %c0_15 = arith.constant 0 : index
    %25 = vector.load %arg5[%c0_14, %c0_15] : memref<8x2xf32, #tpu.memory_space<vmem>>, vector<8x2xf32>
    tpu.vector_store %arg5[%c0_14, %c0_15], %24 {strides = array<i32>} : memref<8x2xf32, #tpu.memory_space<vmem>>, vector<8x2xf32>,
    return
  }
}

</mosaic_0001>

<bundles_post_ra>
// kernel: tpu_custom_call.1
= control target key start
LH: loop header
LB: loop body
LE: loop exit
PB: predicated region body
PF: predicated region fallthrough
CT: control target
= control target key end

     0   :  { %vm34_vm0 = vcmask 1044480   ;;  %v268_v0 = vmov 0.0|0.0   ;;  %vm269_vm1 = vmmov 1   ;;  %vm270_vm3 = vmmov 0   ;;  %s334_s1 = inlined_call_operand.vmem [shape: f32[13,32], index: 1, kind: input, shape index: {}]   ;;  %s335_s3 = inlined_call_operand.vmem [shape: f32[32,2], index: 3, kind: input, shape index: {}]   ;;  %s336_s0 = inlined_call_operand.vmem [shape: f32[8,13], index: 0, kind: input, shape index: {}]   ;;  %s337_s2 = inlined_call_operand.vmem [shape: f32[1,32], index: 2, kind: input, shape index: {}]   ;;  %s338_s4 = inlined_call_operand.vmem [shape: f32[1,2], index: 4, kind: input, shape index: {}]   ;;  %s339_s5 = inlined_call_operand.vmem [shape: f32[8,2], index: 5, kind: output, shape index: {}]  }
   0x1   :  { %248 = vmatprep.subr.bf16.mxu0 %v268_v0  ;;  %v21_v1 = vld [vmem:[%s334_s1] sm:$0xff]  ;;  %v22_v2 = vld [vmem:[%s334_s1 + $0x8] sm:$0x1f]  ;;  %vm250_vm2 = vmpackc.low %vm34_vm0, %vm269_vm1  ;;  %252 = vmatprep.subr.bf16.mxu1 %v268_v0  ;;  %v271_v4 = vmov 0.0   ;;  %vm30_vm4 = vcmask 105472   ;;  %vm120_vm5 = vcmask 261120  }
   0x2   :  { %v249_v3 = vpack.c.bf16 %v22_v2, %v21_v1  ;;  %234 = vmatprep.mubr.msk.f32.mxu0 %vm270_vm3, %v271_v4  ;;  %v109_v5 = vld [vmem:[%s335_s3] sm:$0xff]  ;;  %v110_v6 = vld [vmem:[%s335_s3 + $0x8] sm:$0xff]  ;;  %245 = vmatprep.mubr.msk.f32.mxu1 %vm270_vm3, %v271_v4  ;;  %v111_v9 = vld [vmem:[%s335_s3 + $0x10] sm:$0xff]  ;;  %vm209_vm6 = vcmask 7168   ;;  %vm211_vm7 = vcmask 15360  }
   0x3   :  { %v253_v7 = vpack.c.bf16 %v110_v6, %v109_v5  ;;  %v20_v8 = vld [vmem:[%s336_s0] sm:$0xff]  ;;  %v112_v10 = vld [vmem:[%s335_s3 + $0x18] sm:$0xff]  ;;  %s272_s3 = smov 1  }
   0x4   :  { %251 = vmatpush3.bf16.msk.msra.mxu0 %vm250_vm2, %v249_v3  ;;  %v256_v11 = vpack.c.bf16 %v112_v10, %v111_v9  ;;  %v217_v12 = vld [vmem:[%s337_s2] ss:$0 sm:$0xff]  ;;  %s273_s2 = smov 127  }
   0x5   :  { %254 = vmatpush3.bf16.msra.mxu1 %v253_v7  ;;  %v220_v17 = vld [vmem:[%s338_s4] ss:$0 sm:$0xff] }
   0x6   :  { %255 = vmatprep.subr.bf16.mxu1 %v268_v0 }
   0x7   :  { %235 = vmatmul.mubr.msk.f32.vlgmr.msra.gmra.mrb[0].mxu0 %vm30_vm4, %v20_v8 }
   0x9   :  { %257 = vmatpush3.bf16.msra.mxu1 %v256_v11 }
  0xda   :  { %v104_v13 = vpop.f32.mrb[0].mxu0 }
  0xdb   :  { %v105_v14 = vadd.f32 %v217_v12, %v104_v13  ;;  %v236_v15 = vpop.f32.mrb[1].mxu0 }
  0xdd   :  { %v108_v16 = vmax.f32 %v105_v14, 0.0 }
  0xdf   :  { %246 = vmatmul.mubr.msk.f32.vlgmr.msra.gmra.mrb[0].mxu1 %vm120_vm5, %v108_v16 }
 0x1b2   :  { %v190_v18 = vpop.f32.mrb[0].mxu1 }
 0x1b3   :  { %v191_v19 = vadd.f32 %v220_v17, %v190_v18  ;;  %v247_v20 = vpop.f32.mrb[1].mxu1 }
 0x1b5   :  { %195 = vrot.lane.b32.xlu0 %v191_v19, %s272_s3 }
 0x227   :  { %v196_v21 = vpop.permute.xlu0 %195 }
 0x228   :  { %v198_v22 = vsub.f32 %v191_v19, %v196_v21 }
 0x22a   :  { %v199_v23 = vsub.f32 0.0, %v198_v22 }
 0x22c   :  { %v200_v24 = vmul.f32 1.442695, %v199_v23 }
 0x22e   :  { %264 = vpow2.f32 %v200_v24 }
 0x238   :  { %v265_v25 = vpop.eup %264 }
 0x239   :  { %v202_v26 = vadd.f32 1.0, %v265_v25 }
 0x23b   :  { %266 = vrcp.f32 %v202_v26 }
 0x245   :  { %v267_v27 = vpop.eup %266 }
 0x246   :  { %v204_v28 = vsub.f32 1.0, %v267_v27 }
 0x248   :  { %206 = vrot.lane.b32.xlu0 %v204_v28, %s273_s2 }
 0x2ba   :  { %v207_v29 = vpop.permute.xlu0 %206 }
 0x2bb   :  { %v210_v30 = vsel %vm209_vm6, %v207_v29, %v267_v27 }
 0x2bc   :  { %212 = vst.msk [vmem:[%s339_s5] sm:$0xff] %vm211_vm7, %v210_v30 }

</bundles_post_ra>
